<compile_context>
chip_gen: v6e
topology: v6e:2x2x1
jax: 0.10.0
libtpu: 0.0.40
codegen_flags: <defaults>
</compile_context>

<pallas_src>
import math

import jax
import jax.numpy as jnp
from jax import lax
from jax.experimental import pallas as pl
from jax.experimental.pallas import tpu as pltpu

LN_EPS = 1e-5  # torch.nn.LayerNorm default


def _round_up(x, m):
    return ((x + m - 1) // m) * m


def _make_kernel(p_real: int):
    """Kernel closed over the *real* projection_dim (for masked LayerNorm stats)."""
    inv_p = 1.0 / float(p_real)
    inv_sqrt2 = 1.0 / math.sqrt(2.0)

    def kernel(x_ref, w1_ref, b1_ref, w2_ref, b2_ref, gamma_ref, beta_ref, o_ref):
        # ---- projection = Linear(E, P)(x): native-dtype MXU operands, f32 accum ----
        x = x_ref[...]                                                   # [TM, E]
        projected = jnp.dot(x, w1_ref[...],
                            preferred_element_type=jnp.float32) + b1_ref[...]  # [TM, Pp] f32

        # ---- exact erf GELU (matches torch nn.GELU() default), f32 ----
        g = 0.5 * projected * (1.0 + lax.erf(projected * inv_sqrt2))

        # ---- fc = Linear(P, P)(g) ----
        h = jnp.dot(g.astype(w2_ref.dtype), w2_ref[...],
                    preferred_element_type=jnp.float32) + b2_ref[...]    # [TM, Pp] f32

        # Dropout(p=0.0) is identity; residual add.
        y = h + projected

        # ---- LayerNorm over the real P columns only (padded lanes are exactly 0) ----
        col = lax.broadcasted_iota(jnp.int32, y.shape, dimension=1)
        valid = col < p_real
        mean = jnp.sum(y, axis=-1, keepdims=True) * inv_p        # padded cols contribute 0
        centered = jnp.where(valid, y - mean, 0.0)
        var = jnp.sum(centered * centered, axis=-1, keepdims=True) * inv_p
        inv_std = lax.rsqrt(var + LN_EPS)
        o_ref[...] = (centered * inv_std * gamma_ref[...] + beta_ref[...]).astype(o_ref.dtype)

    return kernel


def projection_head(x, w1, b1, w2, b2, gamma, beta, *, block_m=256):
    """x: [B, E]; w1: [E, P] (pre-transposed); b1: [P]; w2: [P, P]; b2, gamma, beta: [P]."""
    B, E = x.shape
    P = w1.shape[1]

    # Lane-dense projection width (multiple of 128) and sublane-aligned batch tile.
    P_pad = _round_up(P, 128)
    TM = min(_round_up(block_m, 8), _round_up(B, 8))
    B_pad = _round_up(B, TM)

    # Pad once in the wrapper; zero-padded weight columns keep padded lanes identically 0.
    if P_pad != P:
        w1 = jnp.pad(w1, ((0, 0), (0, P_pad - P)))
        w2 = jnp.pad(w2, ((0, P_pad - P), (0, P_pad - P)))
        b1 = jnp.pad(b1, (0, P_pad - P))
        b2 = jnp.pad(b2, (0, P_pad - P))
        gamma = jnp.pad(gamma, (0, P_pad - P))
        beta = jnp.pad(beta, (0, P_pad - P))
    if B_pad != B:
        x = jnp.pad(x, ((0, B_pad - B), (0, 0)))

    # Small per-column params as f32 [1, P_pad] rows so the kernel never re-casts them.
    b1_2d = b1.reshape(1, P_pad).astype(jnp.float32)
    b2_2d = b2.reshape(1, P_pad).astype(jnp.float32)
    gamma_2d = gamma.reshape(1, P_pad).astype(jnp.float32)
    beta_2d = beta.reshape(1, P_pad).astype(jnp.float32)

    grid = (B_pad // TM,)
    resident = lambda shape: pl.BlockSpec(shape, lambda i: tuple(0 for _ in shape))

    # Rough VMEM budget: resident weights + double-buffered x/out tiles + headroom.
    w_bytes = E * P_pad * w1.dtype.itemsize + P_pad * P_pad * w2.dtype.itemsize
    tile_bytes = TM * E * x.dtype.itemsize + TM * P_pad * x.dtype.itemsize
    vmem_limit = int(min(64 << 20, max(32 << 20, 2 * (w_bytes + 2 * tile_bytes) + (8 << 20))))

    out = pl.pallas_call(
        _make_kernel(P),
        out_shape=jax.ShapeDtypeStruct((B_pad, P_pad), x.dtype),
        grid_spec=pltpu.PrefetchScalarGridSpec(
            num_scalar_prefetch=0,
            grid=grid,
            in_specs=[
                pl.BlockSpec((TM, E), lambda i: (i, 0)),   # batch-tiled activations
                resident((E, P_pad)),                      # w1   (VMEM-resident)
                resident((1, P_pad)),                      # b1
                resident((P_pad, P_pad)),                  # w2
                resident((1, P_pad)),                      # b2
                resident((1, P_pad)),                      # gamma
                resident((1, P_pad)),                      # beta
            ],
            out_specs=pl.BlockSpec((TM, P_pad), lambda i: (i, 0)),
        ),
        compiler_params=pltpu.CompilerParams(
            dimension_semantics=("parallel",),
            vmem_limit_bytes=vmem_limit,
        ),
    )(x, w1, b1_2d, w2, b2_2d, gamma_2d, beta_2d)

    return out[:B, :P]


def init_params(key, embedding_dim, projection_dim, dtype=jnp.float32):
    """Deterministic init mirroring nn.Linear / nn.LayerNorm shapes (weights pre-transposed)."""
    k1, k2, k3, k4 = jax.random.split(key, 4)
    bound1 = 1.0 / math.sqrt(embedding_dim)
    bound2 = 1.0 / math.sqrt(projection_dim)
    w1 = jax.random.uniform(k1, (embedding_dim, projection_dim),
                            minval=-bound1, maxval=bound1, dtype=dtype)
    b1 = jax.random.uniform(k2, (projection_dim,),
                            minval=-bound1, maxval=bound1, dtype=dtype)
    w2 = jax.random.uniform(k3, (projection_dim, projection_dim),
                            minval=-bound2, maxval=bound2, dtype=dtype)
    b2 = jax.random.uniform(k4, (projection_dim,),
                            minval=-bound2, maxval=bound2, dtype=dtype)
    gamma = jnp.ones((projection_dim,), dtype=dtype)
    beta = jnp.zeros((projection_dim,), dtype=dtype)
    return w1, b1, w2, b2, gamma, beta


if __name__ == "__main__":
    # Small shapes; B=10 exercises batch-tile padding, P=64 exercises lane padding to 128.
    B, E, P = 10, 32, 64

    key = jax.random.PRNGKey(0)
    kx, kp = jax.random.split(key)
    x = jax.random.normal(kx, (B, E), dtype=jnp.float32)
    w1, b1, w2, b2, gamma, beta = init_params(kp, E, P)

    out = jax.block_until_ready(projection_head(x, w1, b1, w2, b2, gamma, beta))

    # Pure-JAX reference check (exact erf GELU, biased-variance LayerNorm like torch).
    proj = x @ w1 + b1
    g = 0.5 * proj * (1.0 + lax.erf(proj / math.sqrt(2.0)))
    h = g @ w2 + b2
    y = h + proj
    mean = y.mean(-1, keepdims=True)
    var = ((y - mean) ** 2).mean(-1, keepdims=True)
    ref = (y - mean) / jnp.sqrt(var + LN_EPS) * gamma + beta

    assert out.shape == (B, P), f"bad output shape {out.shape}"
    assert jnp.allclose(out, ref, atol=1e-5, rtol=1e-5), "mismatch vs reference"

    print("KERNEL_OK")
</pallas_src>

<mosaic_0001>
module attributes {stable_mosaic.version = 11 : i64} {
  func.func @kernel(%arg0: i32, %arg1: memref<16x32xf32, #tpu.memory_space<vmem>>, %arg2: memref<32x128xf32, #tpu.memory_space<vmem>>, %arg3: memref<1x128xf32, #tpu.memory_space<vmem>>, %arg4: memref<128x128xf32, #tpu.memory_space<vmem>>, %arg5: memref<1x128xf32, #tpu.memory_space<vmem>>, %arg6: memref<1x128xf32, #tpu.memory_space<vmem>>, %arg7: memref<1x128xf32, #tpu.memory_space<vmem>>, %arg8: memref<16x128xf32, #tpu.memory_space<vmem>>) attributes {dimension_semantics = [#tpu.dimension_semantics<parallel>], iteration_bounds = array<i64: 1>, scalar_prefetch = 0 : i64, scratch_operands = 0 : i64, tpu.core_type = #tpu.core_type<tc>, window_params = [{transform_indices = @transform_0, window_bounds = array<i64: 16, 32>}, {pipeline_mode = #tpu.pipeline_mode<synchronous>, transform_indices = @transform_1, window_bounds = array<i64: 32, 128>}, {pipeline_mode = #tpu.pipeline_mode<synchronous>, transform_indices = @transform_2, window_bounds = array<i64: 1, 128>}, {pipeline_mode = #tpu.pipeline_mode<synchronous>, transform_indices = @transform_3, window_bounds = array<i64: 128, 128>}, {pipeline_mode = #tpu.pipeline_mode<synchronous>, transform_indices = @transform_4, window_bounds = array<i64: 1, 128>}, {pipeline_mode = #tpu.pipeline_mode<synchronous>, transform_indices = @transform_5, window_bounds = array<i64: 1, 128>}, {pipeline_mode = #tpu.pipeline_mode<synchronous>, transform_indices = @transform_6, window_bounds = array<i64: 1, 128>}, {transform_indices = @transform_7, window_bounds = array<i64: 16, 128>}]} {
    %c0 = arith.constant 0 : index
    %c0_0 = arith.constant 0 : index
    %0 = vector.load %arg1[%c0, %c0_0] : memref<16x32xf32, #tpu.memory_space<vmem>>, vector<16x32xf32>
    %c0_1 = arith.constant 0 : index
    %c0_2 = arith.constant 0 : index
    %1 = vector.load %arg2[%c0_1, %c0_2] : memref<32x128xf32, #tpu.memory_space<vmem>>, vector<32x128xf32>
    %cst = arith.constant dense<0.000000e+00> : vector<16x128xf32>
    %2 = tpu.matmul %0, %1, %cst {dimension_numbers = #tpu.dot_dimension_numbers<[1], [0], [0], [1], [0, 0, 1, 1], [], []>} : vector<16x32xf32>, vector<32x128xf32>, vector<16x128xf32> -> vector<16x128xf32>
    %c0_3 = arith.constant 0 : index
    %c0_4 = arith.constant 0 : index
    %3 = vector.load %arg3[%c0_3, %c0_4] : memref<1x128xf32, #tpu.memory_space<vmem>>, vector<1x128xf32>
    %4 = vector.broadcast %3 : vector<1x128xf32> to vector<16x128xf32>
    %5 = arith.addf %2, %4 : vector<16x128xf32>
    %cst_5 = arith.constant 5.000000e-01 : f32
    %6 = vector.broadcast %cst_5 : f32 to vector<16x128xf32>
    %7 = arith.mulf %6, %5 : vector<16x128xf32>
    %cst_6 = arith.constant 0.707106769 : f32
    %8 = vector.broadcast %cst_6 : f32 to vector<16x128xf32>
    %9 = arith.mulf %5, %8 : vector<16x128xf32>
    %10 = math.erf %9 : vector<16x128xf32>
    %cst_7 = arith.constant 1.000000e+00 : f32
    %11 = vector.broadcast %cst_7 : f32 to vector<16x128xf32>
    %12 = arith.addf %11, %10 : vector<16x128xf32>
    %13 = arith.mulf %7, %12 : vector<16x128xf32>
    %c0_8 = arith.constant 0 : index
    %c0_9 = arith.constant 0 : index
    %14 = vector.load %arg4[%c0_8, %c0_9] : memref<128x128xf32, #tpu.memory_space<vmem>>, vector<128x128xf32>
    %cst_10 = arith.constant dense<0.000000e+00> : vector<16x128xf32>
    %15 = tpu.matmul %13, %14, %cst_10 {dimension_numbers = #tpu.dot_dimension_numbers<[1], [0], [0], [1], [0, 0, 1, 1], [], []>} : vector<16x128xf32>, vector<128x128xf32>, vector<16x128xf32> -> vector<16x128xf32>
    %c0_11 = arith.constant 0 : index
    %c0_12 = arith.constant 0 : index
    %16 = vector.load %arg5[%c0_11, %c0_12] : memref<1x128xf32, #tpu.memory_space<vmem>>, vector<1x128xf32>
    %17 = vector.broadcast %16 : vector<1x128xf32> to vector<16x128xf32>
    %18 = arith.addf %15, %17 : vector<16x128xf32>
    %19 = arith.addf %18, %5 : vector<16x128xf32>
    %20 = tpu.iota {dimensions = array<i32: 1>} : vector<16x128xi32>
    %c64_i32 = arith.constant 64 : i32
    %21 = vector.broadcast %c64_i32 : i32 to vector<16x128xi32>
    %22 = arith.cmpi slt, %20, %21 : vector<16x128xi32>
    %cst_13 = arith.constant dense<0.000000e+00> : vector<16xf32>
    %23 = vector.multi_reduction <add>, %19, %cst_13 [1] : vector<16x128xf32> to vector<16xf32>
    %24 = vector.shape_cast %23 : vector<16xf32> to vector<16x1xf32>
    %cst_14 = arith.constant 1.562500e-02 : f32
    %25 = vector.broadcast %cst_14 : f32 to vector<16x1xf32>
    %26 = arith.mulf %24, %25 : vector<16x1xf32>
    %27 = vector.broadcast %26 : vector<16x1xf32> to vector<16x128xf32>
    %28 = arith.subf %19, %27 : vector<16x128xf32>
    %cst_15 = arith.constant 0.000000e+00 : f32
    %29 = vector.broadcast %cst_15 : f32 to vector<16x128xf32>
    %30 = arith.select %22, %28, %29 : vector<16x128xi1>, vector<16x128xf32>
    %31 = arith.mulf %30, %30 : vector<16x128xf32>
    %cst_16 = arith.constant dense<0.000000e+00> : vector<16xf32>
    %32 = vector.multi_reduction <add>, %31, %cst_16 [1] : vector<16x128xf32> to vector<16xf32>
    %33 = vector.shape_cast %32 : vector<16xf32> to vector<16x1xf32>
    %cst_17 = arith.constant 1.562500e-02 : f32
    %34 = vector.broadcast %cst_17 : f32 to vector<16x1xf32>
    %35 = arith.mulf %33, %34 : vector<16x1xf32>
    %cst_18 = arith.constant 9.99999974E-6 : f32
    %36 = vector.broadcast %cst_18 : f32 to vector<16x1xf32>
    %37 = arith.addf %35, %36 : vector<16x1xf32>
    %38 = math.rsqrt %37 : vector<16x1xf32>
    %39 = vector.broadcast %38 : vector<16x1xf32> to vector<16x128xf32>
    %40 = arith.mulf %30, %39 : vector<16x128xf32>
    %c0_19 = arith.constant 0 : index
    %c0_20 = arith.constant 0 : index
    %41 = vector.load %arg6[%c0_19, %c0_20] : memref<1x128xf32, #tpu.memory_space<vmem>>, vector<1x128xf32>
    %42 = vector.broadcast %41 : vector<1x128xf32> to vector<16x128xf32>
    %43 = arith.mulf %40, %42 : vector<16x128xf32>
    %c0_21 = arith.constant 0 : index
    %c0_22 = arith.constant 0 : index
    %44 = vector.load %arg7[%c0_21, %c0_22] : memref<1x128xf32, #tpu.memory_space<vmem>>, vector<1x128xf32>
    %45 = vector.broadcast %44 : vector<1x128xf32> to vector<16x128xf32>
    %46 = arith.addf %43, %45 : vector<16x128xf32>
    %c0_23 = arith.constant 0 : index
    %c0_24 = arith.constant 0 : index
    %47 = vector.load %arg8[%c0_23, %c0_24] : memref<16x128xf32, #tpu.memory_space<vmem>>, vector<16x128xf32>
    tpu.vector_store %arg8[%c0_23, %c0_24], %46 {strides = array<i32>} : memref<16x128xf32, #tpu.memory_space<vmem>>, vector<16x128xf32>,
    return
  }
  func.func @transform_0(%arg0: i32) -> (i32, i32) {
    %c0_i32 = arith.constant 0 : i32
    %c0_i32_0 = arith.constant 0 : i32
    return %arg0, %c0_i32 : i32, i32
  }
  func.func @transform_1(%arg0: i32) -> (i32, i32) {
    %c0_i32 = arith.constant 0 : i32
    %c0_i32_0 = arith.constant 0 : i32
    %c0_i32_1 = arith.constant 0 : i32
    return %c0_i32, %c0_i32_0 : i32, i32
  }
  func.func @transform_2(%arg0: i32) -> (i32, i32) {
    %c0_i32 = arith.constant 0 : i32
    %c0_i32_0 = arith.constant 0 : i32
    %c0_i32_1 = arith.constant 0 : i32
    return %c0_i32, %c0_i32_0 : i32, i32
  }
  func.func @transform_3(%arg0: i32) -> (i32, i32) {
    %c0_i32 = arith.constant 0 : i32
    %c0_i32_0 = arith.constant 0 : i32
    %c0_i32_1 = arith.constant 0 : i32
    return %c0_i32, %c0_i32_0 : i32, i32
  }
  func.func @transform_4(%arg0: i32) -> (i32, i32) {
    %c0_i32 = arith.constant 0 : i32
    %c0_i32_0 = arith.constant 0 : i32
    %c0_i32_1 = arith.constant 0 : i32
    return %c0_i32, %c0_i32_0 : i32, i32
  }
  func.func @transform_5(%arg0: i32) -> (i32, i32) {
    %c0_i32 = arith.constant 0 : i32
    %c0_i32_0 = arith.constant 0 : i32
    %c0_i32_1 = arith.constant 0 : i32
    return %c0_i32, %c0_i32_0 : i32, i32
  }
  func.func @transform_6(%arg0: i32) -> (i32, i32) {
    %c0_i32 = arith.constant 0 : i32
    %c0_i32_0 = arith.constant 0 : i32
    %c0_i32_1 = arith.constant 0 : i32
    return %c0_i32, %c0_i32_0 : i32, i32
  }
  func.func @transform_7(%arg0: i32) -> (i32, i32) {
    %c0_i32 = arith.constant 0 : i32
    %c0_i32_0 = arith.constant 0 : i32
    return %arg0, %c0_i32 : i32, i32
  }
}

</mosaic_0001>

<bundles_post_ra>
// kernel: tpu_custom_call.1
= control target key start
LH: loop header
LB: loop body
LE: loop exit
PB: predicated region body
PF: predicated region fallthrough
CT: control target
= control target key end

     0   :  { %12 = vsyncpa [#allocation3], 0  ;;  %s598_s0 = inlined_call_operand.hbm [shape: f32[16,32], index: 0, kind: input, shape index: {}]   ;;  %s599_s1 = inlined_call_operand.hbm [shape: f32[32,128], index: 1, kind: input, shape index: {}]   ;;  %s600_s2 = inlined_call_operand.vmem [shape: f32[1,128], index: 2, kind: input, shape index: {}]   ;;  %s601_s3 = inlined_call_operand.hbm [shape: f32[128,128], index: 3, kind: input, shape index: {}]   ;;  %s602_s4 = inlined_call_operand.vmem [shape: f32[1,128], index: 4, kind: input, shape index: {}]   ;;  %s603_s5 = inlined_call_operand.vmem [shape: f32[1,128], index: 5, kind: input, shape index: {}]   ;;  %s604_s6 = inlined_call_operand.vmem [shape: f32[1,128], index: 6, kind: input, shape index: {}]   ;;  %s605_s7 = inlined_call_operand.hbm [shape: f32[16,128], index: 7, kind: output, shape index: {}]  }
   0x1   :  { %13 = vsyncpa [#allocation6], 0 }
   0x2   :  { %14 = vsyncpa [#allocation4], 0  ;;  %s514_s24 = smov [#allocation5]   ;;  %s515_s26 = smov [#allocation2]  }
   0x3   :  { %s32_s25 = sshll.u32 %s514_s24, 4  ;;  %s20_s27 = sshll.u32 %s515_s26, 4  ;;  %s33_s25 = int_to_ptr.vmem [resolvable:$true] %s32_s25  ;;  %s21_s27 = int_to_ptr.vmem [resolvable:$true] %s20_s27 }
   0x4   :  { %s436_s28 = scalar_lea.vmem %s33_s25, 512  ;;  %p441_p1 = scmp.lt.s32.totalorder %s33_s25, %s33_s25 }
   0x5   :  { %p437_p0 = scmp.ne.s32.totalorder %s33_s25, %s436_s28  ;;  %p442_p2 = scmp.lt.s32.totalorder %s436_s28, %s436_s28 }
   0x7   :  { %p443_p3 = por %p442_p2, %p441_p1 }
   0x9   :  { %p444_p4 = pnand %p443_p3, %p437_p0 }
   0xb   :  { %447 = shalt.err (!%p444_p4)
}
   0xc   :  { %s516_s29 = smov 128   ;;  %s517_s30 = smov 8  }
   0xd   :  { %38 = dma.hbm_to_vmem [thread:$0]  %s599_s1, 512, %s33_s25, [#allocation6], %s516_s29, %s516_s29, %s517_s30  }
   0xe   :  { %s456_s10 = scalar_lea.vmem %s21_s27, 256  ;;  %p461_p6 = scmp.lt.s32.totalorder %s21_s27, %s21_s27 }
   0xf   :  { %p457_p5 = scmp.ne.s32.totalorder %s21_s27, %s456_s10  ;;  %p462_p7 = scmp.lt.s32.totalorder %s456_s10, %s456_s10 }
  0x11   :  { %p463_p8 = por %p462_p7, %p461_p6 }
  0x13   :  { %p464_p9 = pnand %p463_p8, %p457_p5 }
  0x15   :  { %467 = shalt.err (!%p464_p9)
}
  0x16   :  { %26 = dma.hbm_to_vmem [thread:$0]  %s598_s0, 256, %s21_s27, [#allocation3], %s516_s29, %s516_s29, %s517_s30  }
  0x17   :  { %s518_s13 = smov [#allocation7]  }
  0x18   :  { %s46_s14 = sshll.u32 %s518_s13, 4  ;;  %s47_s14 = int_to_ptr.vmem [resolvable:$true] %s46_s14 }
  0x19   :  { %s476_s15 = scalar_lea.vmem %s47_s14, 2048  ;;  %p481_p11 = scmp.lt.s32.totalorder %s47_s14, %s47_s14 }
  0x1a   :  { %p477_p10 = scmp.ne.s32.totalorder %s47_s14, %s476_s15  ;;  %p482_p12 = scmp.lt.s32.totalorder %s476_s15, %s476_s15 }
  0x1c   :  { %p483_p13 = por %p482_p12, %p481_p11 }
  0x1e   :  { %p484_p0 = pnand %p483_p13, %p477_p10 }
  0x20   :  { %487 = shalt.err (!%p484_p0)
}
  0x21   :  { %52 = dma.hbm_to_vmem [thread:$0]  %s601_s3, 2048, %s47_s14, [#allocation6], %s516_s29, %s516_s29, %s517_s30  }
  0x22   :  { %508 = dma.done.wait [#allocation3], 256  }
  0x23   :  { %509 = vsyncadd [#allocation3], 4294967040 }
  0x24   :  { %510 = dma.done.wait [#allocation6], 2560  }
  0x25   :  { %511 = vsyncadd [#allocation6], 4294964736  ;;  %vm81_vm0 = vcmask 261120   ;;  %v73_v0 = vld [vmem:[#allocation5 + $0x18] sm:$0xff]  ;;  %v72_v1 = vld [vmem:[#allocation5 + $0x10] sm:$0xff]  ;;  %v273_v44 = vlaneseq  ;;  %s519_s21 = smov [#allocation8]  }
  0x26   :  { %368 = vmatprep.subr.mxu0 %v73_v0  ;;  %v68_v2 = vld [vmem:[#allocation2] sm:$0xff]  ;;  %v71_v3 = vld [vmem:[#allocation5 + $0x8] sm:$0xff]  ;;  %v188_v4 = vld [vmem:[#allocation7 + $0x78] sm:$0xff]  ;;  %s325_s22 = sshll.u32 %s519_s21, 4  ;;  %s326_s22 = int_to_ptr.vmem [resolvable:$true] %s325_s22 }
  0x27   :  { %369 = vmatpush3.msra.mxu0 %v73_v0  ;;  %376 = vmatprep.mubr.msk.f32.mxu0 %vm81_vm0, %v68_v2  ;;  %v187_v5 = vld [vmem:[#allocation7 + $0x70] sm:$0xff]  ;;  %v70_v6 = vld [vmem:[#allocation5] sm:$0xff]  ;;  %v186_v7 = vld [vmem:[#allocation7 + $0x68] sm:$0xff]  ;;  %v274_v45 = vand.u32 127, %v273_v44  ;;  %s488_s23 = scalar_lea.vmem %s326_s22, 256  ;;  %p493_p2 = scmp.lt.s32.totalorder %s326_s22, %s326_s22 }
  0x28   :  { %370 = vmatprep.subr.mxu0 %v72_v1  ;;  %379 = vmatprep.subr.mxu1 %v188_v4  ;;  %v69_v8 = vld [vmem:[#allocation2 + $0x8] sm:$0xff]  ;;  %v185_v9 = vld [vmem:[#allocation7 + $0x60] sm:$0xff]  ;;  %v183_v11 = vld [vmem:[#allocation7 + $0x50] sm:$0xff]  ;;  %p489_p1 = scmp.ne.s32.totalorder %s326_s22, %s488_s23  ;;  %p494_p3 = scmp.lt.s32.totalorder %s488_s23, %s488_s23 }
  0x29   :  { %371 = vmatpush3.msra.mxu0 %v72_v1  ;;  %380 = vmatpush3.msra.mxu1 %v188_v4  ;;  %v184_v10 = vld [vmem:[#allocation7 + $0x58] sm:$0xff]  ;;  %v182_v12 = vld [vmem:[#allocation7 + $0x48] sm:$0xff]  ;;  %v181_v13 = vld [vmem:[#allocation7 + $0x40] sm:$0xff]  ;;  %vm275_vm1 = vcmp.lt.s32.totalorder %v274_v45, 64 }
  0x2a   :  { %372 = vmatprep.subr.mxu0 %v71_v3  ;;  %381 = vmatprep.subr.mxu1 %v187_v5  ;;  %v180_v14 = vld [vmem:[#allocation7 + $0x38] sm:$0xff]  ;;  %v179_v15 = vld [vmem:[#allocation7 + $0x30] sm:$0xff]  ;;  %v178_v16 = vld [vmem:[#allocation7 + $0x28] sm:$0xff]  ;;  %p495_p4 = por %p494_p3, %p493_p2 }
  0x2b   :  { %373 = vmatpush3.msra.mxu0 %v71_v3  ;;  %382 = vmatpush3.msra.mxu1 %v187_v5  ;;  %v177_v17 = vld [vmem:[#allocation7 + $0x20] sm:$0xff]  ;;  %v176_v18 = vld [vmem:[#allocation7 + $0x18] sm:$0xff]  ;;  %v175_v19 = vld [vmem:[#allocation7 + $0x10] sm:$0xff] }
  0x2c   :  { %374 = vmatprep.subr.mxu0 %v70_v6  ;;  %383 = vmatprep.subr.mxu1 %v186_v7  ;;  %v174_v20 = vld [vmem:[#allocation7 + $0x8] sm:$0xff]  ;;  %v173_v21 = vld [vmem:[#allocation7] sm:$0xff]  ;;  %v338_v22 = vld [vmem:[%s600_s2] ss:$0 sm:$0xff]  ;;  %p496_p5 = pnand %p495_p4, %p489_p1 }
  0x2d   :  { %375 = vmatpush3.msra.mxu0 %v70_v6  ;;  %384 = vmatpush3.msra.mxu1 %v186_v7  ;;  %v341_v38 = vld [vmem:[%s602_s4] ss:$0 sm:$0xff] }
  0x2e   :  { %377 = vmatmul.mubr.msk.f32.vlgmr.msra.gmra.mxu0 %vm81_vm0, %v69_v8  ;;  %385 = vmatprep.subr.mxu1 %v185_v9  ;;  %v342_v63 = vld [vmem:[%s603_s5] ss:$0 sm:$0xff] }
  0x2f   :  { %386 = vmatpush3.msra.mxu1 %v185_v9  ;;  %v343_v1 = vld [vmem:[%s604_s6] ss:$0 sm:$0xff] }
  0x30   :  { %387 = vmatprep.subr.mxu1 %v184_v10 }
  0x31   :  { %388 = vmatpush3.msra.mxu1 %v184_v10 }
  0x32   :  { %389 = vmatprep.subr.mxu1 %v183_v11 }
  0x33   :  { %390 = vmatpush3.msra.mxu1 %v183_v11 }
  0x34   :  { %391 = vmatprep.subr.mxu1 %v182_v12 }
  0x35   :  { %392 = vmatpush3.msra.mxu1 %v182_v12 }
  0x36   :  { %393 = vmatprep.subr.mxu1 %v181_v13 }
  0x37   :  { %394 = vmatpush3.msra.mxu1 %v181_v13 }
  0x38   :  { %395 = vmatprep.subr.mxu1 %v180_v14 }
  0x39   :  { %396 = vmatpush3.msra.mxu1 %v180_v14 }
  0x3a   :  { %397 = vmatprep.subr.mxu1 %v179_v15 }
  0x3b   :  { %398 = vmatpush3.msra.mxu1 %v179_v15 }
  0x3c   :  { %399 = vmatprep.subr.mxu1 %v178_v16 }
  0x3d   :  { %400 = vmatpush3.msra.mxu1 %v178_v16 }
  0x3e   :  { %401 = vmatprep.subr.mxu1 %v177_v17 }
  0x3f   :  { %402 = vmatpush3.msra.mxu1 %v177_v17 }
  0x40   :  { %403 = vmatprep.subr.mxu1 %v176_v18 }
  0x41   :  { %404 = vmatpush3.msra.mxu1 %v176_v18 }
  0x42   :  { %405 = vmatprep.subr.mxu1 %v175_v19 }
  0x43   :  { %406 = vmatpush3.msra.mxu1 %v175_v19 }
  0x44   :  { %407 = vmatprep.subr.mxu1 %v174_v20 }
  0x45   :  { %408 = vmatpush3.msra.mxu1 %v174_v20 }
  0x46   :  { %409 = vmatprep.subr.mxu1 %v173_v21 }
  0x47   :  { %410 = vmatpush3.msra.mxu1 %v173_v21 }
  0xee   :  { %v378_v23 = vpop.f32.mrf.mxu0 }
  0xef   :  { %v160_v24 = vadd.f32 %v378_v23, %v338_v22 }
  0xf0   :  { %v154_v25 = vpop.f32.mrf.mxu0 }
  0xf1   :  { %v166_v26 = vmul.f32 0.70710677, %v160_v24  ;;  %v155_v27 = vadd.f32 %v338_v22, %v154_v25  ;;  %v164_v34 = vmul.f32 0.5, %v160_v24 }
  0xf3   :  { %420 = verf.f32 %v166_v26  ;;  %v165_v28 = vmul.f32 0.70710677, %v155_v27  ;;  %v163_v32 = vmul.f32 0.5, %v155_v27 }
  0xf5   :  { %422 = verf.f32 %v165_v28 }
 0x100   :  { %v421_v29 = vpop.eup %420 }
 0x101   :  { %v170_v31 = vadd.f32 1.0, %v421_v29 }
 0x102   :  { %v423_v30 = vpop.eup %422 }
 0x103   :  { %v169_v33 = vadd.f32 1.0, %v423_v30  ;;  %v172_v36 = vmul.f32 %v170_v31, %v164_v34 }
 0x105   :  { %v171_v35 = vmul.f32 %v169_v33, %v163_v32 }
 0x107   :  { %411 = vmatprep.mubr.f32.mxu1 %v171_v35 }
 0x108   :  { %412 = vmatmul.mubr.f32.vlgmr.msra.gmra.mxu1 %v172_v36 }
 0x1c8   :  { %v413_v37 = vpop.f32.mrf.mxu1 }
 0x1c9   :  { %v268_v41 = vadd.f32 %v413_v37, %v341_v38 }
 0x1ca   :  { %v262_v39 = vpop.f32.mrf.mxu1 }
 0x1cb   :  { %v263_v40 = vadd.f32 %v341_v38, %v262_v39  ;;  %v272_v43 = vadd.f32 %v268_v41, %v160_v24 }
 0x1cd   :  { %v271_v42 = vadd.f32 %v263_v40, %v155_v27 }
 0x1cf   :  { %276 = vadd.xlane.f32.xlu0 %v271_v42 }
 0x1d3   :  { %278 = vadd.xlane.f32.xlu0 %v272_v43 }
 0x258   :  { %v277_v46 = vpop.xlane.xlu0 %276 }
 0x259   :  { %v280_v47 = vmul.f32 0.015625, %v277_v46 }
 0x25b   :  { %v282_v48 = vsub.f32 %v271_v42, %v280_v47 }
 0x25c   :  { %v279_v49 = vpop.xlane.xlu0 %278 }
 0x25d   :  { %v281_v50 = vmul.f32 0.015625, %v279_v49  ;;  %v284_v51 = vsel %vm275_vm1, %v282_v48, 0.0 }
 0x25e   :  { %v286_v52 = vmul.f32 %v284_v51, %v284_v51 }
 0x25f   :  { %v283_v53 = vsub.f32 %v272_v43, %v281_v50 }
 0x260   :  { %288 = vadd.xlane.f32.xlu1 %v286_v52 }
 0x261   :  { %v285_v54 = vsel %vm275_vm1, %v283_v53, 0.0 }
 0x262   :  { %v287_v55 = vmul.f32 %v285_v54, %v285_v54 }
 0x264   :  { %290 = vadd.xlane.f32.xlu1 %v287_v55 }
 0x2e9   :  { %v289_v56 = vpop.xlane.xlu1 %288 }
 0x2ea   :  { %v292_v57 = vmul.f32 0.015625, %v289_v56 }
 0x2ec   :  { %v294_v58 = vadd.f32 1e-05, %v292_v57 }
 0x2ed   :  { %v291_v59 = vpop.xlane.xlu1 %290 }
 0x2ee   :  { %424 = vrsqrt.f32 %v294_v58  ;;  %v293_v60 = vmul.f32 0.015625, %v291_v59 }
 0x2f0   :  { %v295_v61 = vadd.f32 1e-05, %v293_v60 }
 0x2f2   :  { %426 = vrsqrt.f32 %v295_v61 }
 0x2fb   :  { %v425_v62 = vpop.eup %424 }
 0x2fc   :  { %v298_v0 = vmul.f32 %v425_v62, %v284_v51 }
 0x2fe   :  { %v307_v2 = vmul.f32 %v342_v63, %v298_v0 }
 0x2ff   :  { %v427_v3 = vpop.eup %426 }
 0x300   :  { %v299_v4 = vmul.f32 %v427_v3, %v285_v54  ;;  %v316_v5 = vadd.f32 %v343_v1, %v307_v2 }
 0x302   :  { %v308_v6 = vmul.f32 %v342_v63, %v299_v4  ;;  %318 = vst [vmem:[#allocation8] sm:$0xff] %v316_v5 }
 0x304   :  { %v317_v7 = vadd.f32 %v343_v1, %v308_v6 }
 0x306   :  { %319 = vst [vmem:[#allocation8 + $0x8] sm:$0xff] %v317_v7 }
 0x307   :  { %499 = shalt.err (!%p496_p5)
}
 0x308   :  { %331 = dma.vmem_to_hbm [thread:$0]  %s326_s22, 256, %s605_s7, [#allocation4], %s516_s29, %s516_s29, %s517_s30  }
 0x309   :  { %512 = dma.done.wait [#allocation4], 256  }
 0x30a   :  { %513 = vsyncadd [#allocation4], 4294967040 }
 0x30b   :  { %335 = vsyncpa [#allocation3], 1 }
 0x30c   :  { %336 = vsyncpa [#allocation6], 1 }
 0x30d   :  { %337 = vsyncpa [#allocation4], 1 }

</bundles_post_ra>
